<compile_context>
chip_gen: v6e
topology: v6e:2x2x1
jax: 0.10.0
libtpu: 0.0.40
codegen_flags: <defaults>
</compile_context>

<pallas_src>
import functools

import jax
import jax.numpy as jnp
from jax import lax
from jax.experimental import pallas as pl
from jax.experimental.pallas import tpu as pltpu


# ----------------------------------------------------------------------------
# In-kernel helpers
# ----------------------------------------------------------------------------
def _heads_attention_rows(qkv_rows, wproj, *, heads, C, kmask=None):
    """Per-head attention + output projection for one batch element.

    qkv_rows: (S, 3C) f32 fused QKV activations (q columns already pre-scaled).
    wproj:    (C, C) output-projection weight.
    kmask:    optional (S, S) bool mask, True where the key column is valid.
    Returns (S, C) f32 (bias not added).
    """
    D = C // heads
    out = None
    for h in range(heads):                                 # static unroll; heads is small
        q = qkv_rows[:, h * D:(h + 1) * D]
        k = qkv_rows[:, C + h * D:C + (h + 1) * D]
        v = qkv_rows[:, 2 * C + h * D:2 * C + (h + 1) * D]
        # q @ k^T without materializing a transpose of k (scale folded into q).
        s = lax.dot_general(q, k, (((1,), (1,)), ((), ())),
                            preferred_element_type=jnp.float32)
        if kmask is not None:
            s = jnp.where(kmask, s, jnp.float32(-1e30))    # padded keys -> ~-inf
        s = s - jnp.max(s, axis=-1, keepdims=True)
        p = jnp.exp(s)
        inv = pl.reciprocal(jnp.sum(p, axis=-1, keepdims=True))
        # normalize the (S, D) PV result instead of the (S, S) probabilities
        o_h = jnp.dot(p, v, preferred_element_type=jnp.float32) * inv
        # lane-dense accumulation: concat_h(o_h) @ Wproj == sum_h o_h @ Wproj_h
        contrib = jnp.dot(o_h, wproj[h * D:(h + 1) * D, :],
                          preferred_element_type=jnp.float32)
        out = contrib if out is None else out + contrib
    return out


def _attn_kernel(x_ref, wqkv_ref, bqkv_ref, wproj_ref, bproj_ref, o_ref, *,
                 G, N, C, heads):
    x = x_ref[...]                                         # (G*N, C), input dtype (no upcast)
    # Fused QKV projection for all heads / all batch rows in this step.
    qkv = jnp.dot(x, wqkv_ref[...],
                  preferred_element_type=jnp.float32) + bqkv_ref[...]
    wproj = wproj_ref[...]
    outs = []
    for b in range(G):                                     # static unroll (G is 1 or 2)
        outs.append(_heads_attention_rows(qkv[b * N:(b + 1) * N], wproj,
                                          heads=heads, C=C))
    out = outs[0] if G == 1 else jnp.concatenate(outs, axis=0)
    o_ref[...] = (out + bproj_ref[...]).astype(o_ref.dtype)


def _attn_gt_kernel(x_ref, gt_ref, wqkv_ref, bqkv_ref, wproj_ref, bproj_ref,
                    lng_ref, lnb_ref, o_ref, seq_ref, *,
                    G, N, M, S_pad, C, heads):
    S = N + M
    x = x_ref[...]                                         # (G*N, C)
    wproj = wproj_ref[...]
    bproj = bproj_ref[...]

    # Batch-invariant general-token proj + LayerNorm: computed ONCE per call.
    gt = jnp.dot(gt_ref[...], wproj, preferred_element_type=jnp.float32) + bproj
    mean = jnp.mean(gt, axis=-1, keepdims=True)
    var = jnp.mean((gt - mean) ** 2, axis=-1, keepdims=True)
    gt = (gt - mean) * lax.rsqrt(var + 1e-5) * lng_ref[...] + lnb_ref[...]
    gt = gt.astype(seq_ref.dtype)

    # Build a sublane-aligned padded sequence slab in VMEM scratch:
    #   rows [b*S_pad, b*S_pad+N)       <- x[b]
    #   rows [b*S_pad+N, b*S_pad+N+M)   <- LN(proj(general_token))
    #   rows [b*S_pad+S, (b+1)*S_pad)   <- 0 (masked out of the softmax)
    seq_ref[...] = jnp.zeros_like(seq_ref)
    for b in range(G):
        seq_ref[b * S_pad:b * S_pad + N, :] = x[b * N:(b + 1) * N].astype(seq_ref.dtype)
        seq_ref[b * S_pad + N:b * S_pad + N + M, :] = gt

    qkv = jnp.dot(seq_ref[...], wqkv_ref[...],
                  preferred_element_type=jnp.float32) + bqkv_ref[...]

    col = lax.broadcasted_iota(jnp.int32, (S_pad, S_pad), 1)
    kmask = col < S                                        # shared by all heads/batches
    outs = []
    for b in range(G):
        outs.append(_heads_attention_rows(qkv[b * S_pad:(b + 1) * S_pad], wproj,
                                          heads=heads, C=C, kmask=kmask))
    out = outs[0] if G == 1 else jnp.concatenate(outs, axis=0)
    o_ref[...] = (out + bproj).astype(o_ref.dtype)


# ----------------------------------------------------------------------------
# Host-side helpers
# ----------------------------------------------------------------------------
def pack_attention_params(params, heads):
    """One-time weight repack (do this at parameter init, NOT per forward).

    Keeps lane-dense 2-D slabs and folds the softmax scale into the q columns
    of the fused QKV projection.
    """
    C = params["w_proj"].shape[0]
    D = C // heads
    scale = D ** (-0.5)
    w_qkv = params["w_qkv"].reshape(C, 3 * C)
    b_qkv = params["b_qkv"].reshape(1, 3 * C)
    w_qkv = w_qkv.at[:, :C].multiply(scale)                # scale folded into q weights
    b_qkv = b_qkv.at[:, :C].multiply(scale)                # ... and q bias
    return {
        "w_qkv": w_qkv,                                    # (C, 3C)
        "b_qkv": b_qkv,                                    # (1, 3C)
        "w_proj": params["w_proj"].reshape(C, C),          # (C, C)
        "b_proj": params["b_proj"].reshape(1, C),          # (1, C)
        "ln_g": params["ln_g"].reshape(1, C),              # (1, C)
        "ln_b": params["ln_b"].reshape(1, C),              # (1, C)
    }


def _batch_splits(B, rows_per_batch):
    """Grid steps: split the batch across TensorCores only on multi-TC chips
    (v7x has 2 TCs). On single-TC chips (v5e/v6e) a multi-step grid is pure
    per-step overhead, so everything collapses into one invocation."""
    if B % 2 != 0 or ((B // 2) * rows_per_batch) % 8 != 0:
        return 1
    try:
        kind = jax.devices()[0].device_kind.lower()
    except Exception:
        return 1
    return 2 if ("v7" in kind or "7x" in kind) else 1


def attention_forward(packed, x, heads, general_token=None):
    """Forward pass of the Segmenter Attention module (dropout=0 / eval mode).

    `packed` must come from `pack_attention_params` (one-time repack)."""
    B, N, C = x.shape
    x2d = x.reshape(B * N, C)                              # free reshape, lane-dense 2-D slab

    splits = _batch_splits(B, N)
    G = B // splits

    def fixed2d(shape):
        return pl.BlockSpec(shape, lambda i: (0, 0))

    cp = pltpu.CompilerParams(dimension_semantics=("parallel",))

    if general_token is None:
        kern = functools.partial(_attn_kernel, G=G, N=N, C=C, heads=heads)
        out = pl.pallas_call(
            kern,
            out_shape=jax.ShapeDtypeStruct((B * N, C), x.dtype),
            grid=(splits,),
            in_specs=[
                pl.BlockSpec((G * N, C), lambda i: (i, 0)),
                fixed2d((C, 3 * C)),
                fixed2d((1, 3 * C)),
                fixed2d((C, C)),
                fixed2d((1, C)),
            ],
            out_specs=pl.BlockSpec((G * N, C), lambda i: (i, 0)),
            compiler_params=cp,
        )(x2d, packed["w_qkv"], packed["b_qkv"], packed["w_proj"],
          packed["b_proj"])
        return out.reshape(B, N, C)

    M = general_token.shape[-2]
    S = N + M
    S_pad = ((S + 7) // 8) * 8                             # sublane-aligned sequence length
    gt2d = general_token.reshape(M, C)                     # batch-invariant; broadcast in kernel
    kern = functools.partial(_attn_gt_kernel, G=G, N=N, M=M, S_pad=S_pad,
                             C=C, heads=heads)
    out = pl.pallas_call(
        kern,
        out_shape=jax.ShapeDtypeStruct((B * S_pad, C), x.dtype),
        grid=(splits,),
        in_specs=[
            pl.BlockSpec((G * N, C), lambda i: (i, 0)),
            fixed2d((M, C)),
            fixed2d((C, 3 * C)),
            fixed2d((1, 3 * C)),
            fixed2d((C, C)),
            fixed2d((1, C)),
            fixed2d((1, C)),
            fixed2d((1, C)),
        ],
        out_specs=pl.BlockSpec((G * S_pad, C), lambda i: (i, 0)),
        scratch_shapes=[pltpu.VMEM((G * S_pad, C), x.dtype)],
        compiler_params=cp,
    )(x2d, gt2d, packed["w_qkv"], packed["b_qkv"], packed["w_proj"],
      packed["b_proj"], packed["ln_g"], packed["ln_b"])
    # Kernel stores a tile-aligned padded slab; drop the padded rows here.
    return out.reshape(B, S_pad, C)[:, :S, :]


# ----------------------------------------------------------------------------
# Pure-JAX reference (mirrors the PyTorch forward exactly)
# ----------------------------------------------------------------------------
def attention_reference(params, x, heads, general_token=None):
    B, N, C = x.shape
    D = C // heads
    scale = D ** (-0.5)

    if general_token is not None:
        gt = jnp.broadcast_to(general_token, (B,) + general_token.shape[-2:])
        gt = gt @ params["w_proj"] + params["b_proj"]
        mean = jnp.mean(gt, axis=-1, keepdims=True)
        var = jnp.mean((gt - mean) ** 2, axis=-1, keepdims=True)
        gt = (gt - mean) * lax.rsqrt(var + 1e-5) * params["ln_g"] + params["ln_b"]
        kv_in = jnp.concatenate([x, gt], axis=1)
    else:
        kv_in = x

    S = kv_in.shape[1]
    qkv = (kv_in @ params["w_qkv"] + params["b_qkv"]).reshape(B, S, 3, heads, D)
    qkv = jnp.transpose(qkv, (2, 0, 3, 1, 4))
    q, k, v = qkv[0], qkv[1], qkv[2]
    attn = jnp.einsum("bhqd,bhkd->bhqk", q, k) * scale
    attn = jax.nn.softmax(attn, axis=-1)
    o = jnp.einsum("bhqk,bhkd->bhqd", attn, v)
    o = jnp.transpose(o, (0, 2, 1, 3)).reshape(B, S, C)
    return o @ params["w_proj"] + params["b_proj"]


# ----------------------------------------------------------------------------
# main
# ----------------------------------------------------------------------------
if __name__ == "__main__":
    B, N, C, heads = 2, 8, 32, 4            # dim=32, heads=4, dropout=0.0
    key = jax.random.PRNGKey(0)
    ks = jax.random.split(key, 8)

    # Parameters (PyTorch Linear weight (out, in) stored transposed as (in, out)).
    params = {
        "w_qkv": (0.02 * jax.random.normal(ks[0], (C, 3 * C))).astype(jnp.float32),
        "b_qkv": (0.02 * jax.random.normal(ks[1], (1, 3 * C))).astype(jnp.float32),
        "w_proj": (0.02 * jax.random.normal(ks[2], (C, C))).astype(jnp.float32),
        "b_proj": (0.02 * jax.random.normal(ks[3], (1, C))).astype(jnp.float32),
        "ln_g": jnp.ones((1, C), jnp.float32),
        "ln_b": jnp.zeros((1, C), jnp.float32),
    }
    packed = pack_attention_params(params, heads)   # one-time repack (init-time)

    x = jax.random.normal(ks[4], (B, N, C), jnp.float32)
    general_token = jax.random.normal(ks[5], (1, 1, C), jnp.float32)

    # Path 1: general_token=None
    out1 = attention_forward(packed, x, heads, general_token=None)
    out1 = jax.block_until_ready(out1)
    ref1 = attention_reference(params, x, heads, general_token=None)
    assert out1.shape == (B, N, C)
    assert jnp.allclose(out1, ref1, atol=1e-4, rtol=1e-4)

    # Path 2: with general_token (output has N+1 tokens)
    out2 = attention_forward(packed, x, heads, general_token=general_token)
    out2 = jax.block_until_ready(out2)
    ref2 = attention_reference(params, x, heads, general_token=general_token)
    assert out2.shape == (B, N + 1, C)
    assert jnp.allclose(out2, ref2, atol=1e-4, rtol=1e-4)

    print("KERNEL_OK")
</pallas_src>

<mosaic_0001>
module attributes {stable_mosaic.version = 11 : i64} {
  func.func @_attn_kernel(%arg0: i32, %arg1: memref<16x32xf32, #tpu.memory_space<vmem>>, %arg2: memref<32x96xf32, #tpu.memory_space<vmem>>, %arg3: memref<1x96xf32, #tpu.memory_space<vmem>>, %arg4: memref<32x32xf32, #tpu.memory_space<vmem>>, %arg5: memref<1x32xf32, #tpu.memory_space<vmem>>, %arg6: memref<16x32xf32, #tpu.memory_space<vmem>>) attributes {dimension_semantics = [#tpu.dimension_semantics<parallel>], iteration_bounds = array<i64: 1>, scalar_prefetch = 0 : i64, scratch_operands = 0 : i64, tpu.core_type = #tpu.core_type<tc>, window_params = [{transform_indices = @transform_0, window_bounds = array<i64: 16, 32>}, {pipeline_mode = #tpu.pipeline_mode<synchronous>, transform_indices = @transform_1, window_bounds = array<i64: 32, 96>}, {pipeline_mode = #tpu.pipeline_mode<synchronous>, transform_indices = @transform_2, window_bounds = array<i64: 1, 96>}, {pipeline_mode = #tpu.pipeline_mode<synchronous>, transform_indices = @transform_3, window_bounds = array<i64: 32, 32>}, {pipeline_mode = #tpu.pipeline_mode<synchronous>, transform_indices = @transform_4, window_bounds = array<i64: 1, 32>}, {transform_indices = @transform_5, window_bounds = array<i64: 16, 32>}]} {
    %c0 = arith.constant 0 : index
    %c0_0 = arith.constant 0 : index
    %0 = vector.load %arg1[%c0, %c0_0] : memref<16x32xf32, #tpu.memory_space<vmem>>, vector<16x32xf32>
    %c0_1 = arith.constant 0 : index
    %c0_2 = arith.constant 0 : index
    %1 = vector.load %arg2[%c0_1, %c0_2] : memref<32x96xf32, #tpu.memory_space<vmem>>, vector<32x96xf32>
    %cst = arith.constant dense<0.000000e+00> : vector<16x96xf32>
    %2 = tpu.matmul %0, %1, %cst {dimension_numbers = #tpu.dot_dimension_numbers<[1], [0], [0], [1], [0, 0, 1, 1], [], []>} : vector<16x32xf32>, vector<32x96xf32>, vector<16x96xf32> -> vector<16x96xf32>
    %c0_3 = arith.constant 0 : index
    %c0_4 = arith.constant 0 : index
    %3 = vector.load %arg3[%c0_3, %c0_4] : memref<1x96xf32, #tpu.memory_space<vmem>>, vector<1x96xf32>
    %4 = vector.broadcast %3 : vector<1x96xf32> to vector<16x96xf32>
    %5 = arith.addf %2, %4 : vector<16x96xf32>
    %c0_5 = arith.constant 0 : index
    %c0_6 = arith.constant 0 : index
    %6 = vector.load %arg4[%c0_5, %c0_6] : memref<32x32xf32, #tpu.memory_space<vmem>>, vector<32x32xf32>
    %7 = vector.extract_strided_slice %5 {offsets = [0, 0], sizes = [8, 96], strides = [1, 1]} : vector<16x96xf32> to vector<8x96xf32>
    %8 = vector.extract_strided_slice %7 {offsets = [0, 0], sizes = [8, 8], strides = [1, 1]} : vector<8x96xf32> to vector<8x8xf32>
    %9 = vector.extract_strided_slice %7 {offsets = [0, 32], sizes = [8, 8], strides = [1, 1]} : vector<8x96xf32> to vector<8x8xf32>
    %10 = vector.extract_strided_slice %7 {offsets = [0, 64], sizes = [8, 8], strides = [1, 1]} : vector<8x96xf32> to vector<8x8xf32>
    %cst_7 = arith.constant dense<0.000000e+00> : vector<8x8xf32>
    %11 = tpu.matmul %8, %9, %cst_7 {dimension_numbers = #tpu.dot_dimension_numbers<[1], [1], [0], [0], [0, 0, 1, 0], [], []>} : vector<8x8xf32>, vector<8x8xf32>, vector<8x8xf32> -> vector<8x8xf32>
    %cst_8 = arith.constant dense<0xFF800000> : vector<8xf32>
    %12 = vector.multi_reduction <maximumf>, %11, %cst_8 [1] : vector<8x8xf32> to vector<8xf32>
    %13 = vector.shape_cast %12 : vector<8xf32> to vector<8x1xf32>
    %14 = vector.broadcast %13 : vector<8x1xf32> to vector<8x8xf32>
    %15 = arith.subf %11, %14 : vector<8x8xf32>
    %16 = math.exp %15 : vector<8x8xf32>
    %cst_9 = arith.constant dense<0.000000e+00> : vector<8xf32>
    %17 = vector.multi_reduction <add>, %16, %cst_9 [1] : vector<8x8xf32> to vector<8xf32>
    %18 = vector.shape_cast %17 : vector<8xf32> to vector<8x1xf32>
    %19 = tpu.reciprocal %18 : vector<8x1xf32> -> vector<8x1xf32>
    %cst_10 = arith.constant dense<0.000000e+00> : vector<8x8xf32>
    %20 = tpu.matmul %16, %10, %cst_10 {dimension_numbers = #tpu.dot_dimension_numbers<[1], [0], [0], [1], [0, 0, 1, 1], [], []>} : vector<8x8xf32>, vector<8x8xf32>, vector<8x8xf32> -> vector<8x8xf32>
    %21 = vector.broadcast %19 : vector<8x1xf32> to vector<8x8xf32>
    %22 = arith.mulf %20, %21 : vector<8x8xf32>
    %23 = vector.extract_strided_slice %6 {offsets = [0, 0], sizes = [8, 32], strides = [1, 1]} : vector<32x32xf32> to vector<8x32xf32>
    %cst_11 = arith.constant dense<0.000000e+00> : vector<8x32xf32>
    %24 = tpu.matmul %22, %23, %cst_11 {dimension_numbers = #tpu.dot_dimension_numbers<[1], [0], [0], [1], [0, 0, 1, 1], [], []>} : vector<8x8xf32>, vector<8x32xf32>, vector<8x32xf32> -> vector<8x32xf32>
    %25 = vector.extract_strided_slice %7 {offsets = [0, 8], sizes = [8, 8], strides = [1, 1]} : vector<8x96xf32> to vector<8x8xf32>
    %26 = vector.extract_strided_slice %7 {offsets = [0, 40], sizes = [8, 8], strides = [1, 1]} : vector<8x96xf32> to vector<8x8xf32>
    %27 = vector.extract_strided_slice %7 {offsets = [0, 72], sizes = [8, 8], strides = [1, 1]} : vector<8x96xf32> to vector<8x8xf32>
    %cst_12 = arith.constant dense<0.000000e+00> : vector<8x8xf32>
    %28 = tpu.matmul %25, %26, %cst_12 {dimension_numbers = #tpu.dot_dimension_numbers<[1], [1], [0], [0], [0, 0, 1, 0], [], []>} : vector<8x8xf32>, vector<8x8xf32>, vector<8x8xf32> -> vector<8x8xf32>
    %cst_13 = arith.constant dense<0xFF800000> : vector<8xf32>
    %29 = vector.multi_reduction <maximumf>, %28, %cst_13 [1] : vector<8x8xf32> to vector<8xf32>
    %30 = vector.shape_cast %29 : vector<8xf32> to vector<8x1xf32>
    %31 = vector.broadcast %30 : vector<8x1xf32> to vector<8x8xf32>
    %32 = arith.subf %28, %31 : vector<8x8xf32>
    %33 = math.exp %32 : vector<8x8xf32>
    %cst_14 = arith.constant dense<0.000000e+00> : vector<8xf32>
    %34 = vector.multi_reduction <add>, %33, %cst_14 [1] : vector<8x8xf32> to vector<8xf32>
    %35 = vector.shape_cast %34 : vector<8xf32> to vector<8x1xf32>
    %36 = tpu.reciprocal %35 : vector<8x1xf32> -> vector<8x1xf32>
    %cst_15 = arith.constant dense<0.000000e+00> : vector<8x8xf32>
    %37 = tpu.matmul %33, %27, %cst_15 {dimension_numbers = #tpu.dot_dimension_numbers<[1], [0], [0], [1], [0, 0, 1, 1], [], []>} : vector<8x8xf32>, vector<8x8xf32>, vector<8x8xf32> -> vector<8x8xf32>
    %38 = vector.broadcast %36 : vector<8x1xf32> to vector<8x8xf32>
    %39 = arith.mulf %37, %38 : vector<8x8xf32>
    %40 = vector.extract_strided_slice %6 {offsets = [8, 0], sizes = [8, 32], strides = [1, 1]} : vector<32x32xf32> to vector<8x32xf32>
    %cst_16 = arith.constant dense<0.000000e+00> : vector<8x32xf32>
    %41 = tpu.matmul %39, %40, %cst_16 {dimension_numbers = #tpu.dot_dimension_numbers<[1], [0], [0], [1], [0, 0, 1, 1], [], []>} : vector<8x8xf32>, vector<8x32xf32>, vector<8x32xf32> -> vector<8x32xf32>
    %42 = arith.addf %24, %41 : vector<8x32xf32>
    %43 = vector.extract_strided_slice %7 {offsets = [0, 16], sizes = [8, 8], strides = [1, 1]} : vector<8x96xf32> to vector<8x8xf32>
    %44 = vector.extract_strided_slice %7 {offsets = [0, 48], sizes = [8, 8], strides = [1, 1]} : vector<8x96xf32> to vector<8x8xf32>
    %45 = vector.extract_strided_slice %7 {offsets = [0, 80], sizes = [8, 8], strides = [1, 1]} : vector<8x96xf32> to vector<8x8xf32>
    %cst_17 = arith.constant dense<0.000000e+00> : vector<8x8xf32>
    %46 = tpu.matmul %43, %44, %cst_17 {dimension_numbers = #tpu.dot_dimension_numbers<[1], [1], [0], [0], [0, 0, 1, 0], [], []>} : vector<8x8xf32>, vector<8x8xf32>, vector<8x8xf32> -> vector<8x8xf32>
    %cst_18 = arith.constant dense<0xFF800000> : vector<8xf32>
    %47 = vector.multi_reduction <maximumf>, %46, %cst_18 [1] : vector<8x8xf32> to vector<8xf32>
    %48 = vector.shape_cast %47 : vector<8xf32> to vector<8x1xf32>
    %49 = vector.broadcast %48 : vector<8x1xf32> to vector<8x8xf32>
    %50 = arith.subf %46, %49 : vector<8x8xf32>
    %51 = math.exp %50 : vector<8x8xf32>
    %cst_19 = arith.constant dense<0.000000e+00> : vector<8xf32>
    %52 = vector.multi_reduction <add>, %51, %cst_19 [1] : vector<8x8xf32> to vector<8xf32>
    %53 = vector.shape_cast %52 : vector<8xf32> to vector<8x1xf32>
    %54 = tpu.reciprocal %53 : vector<8x1xf32> -> vector<8x1xf32>
    %cst_20 = arith.constant dense<0.000000e+00> : vector<8x8xf32>
    %55 = tpu.matmul %51, %45, %cst_20 {dimension_numbers = #tpu.dot_dimension_numbers<[1], [0], [0], [1], [0, 0, 1, 1], [], []>} : vector<8x8xf32>, vector<8x8xf32>, vector<8x8xf32> -> vector<8x8xf32>
    %56 = vector.broadcast %54 : vector<8x1xf32> to vector<8x8xf32>
    %57 = arith.mulf %55, %56 : vector<8x8xf32>
    %58 = vector.extract_strided_slice %6 {offsets = [16, 0], sizes = [8, 32], strides = [1, 1]} : vector<32x32xf32> to vector<8x32xf32>
    %cst_21 = arith.constant dense<0.000000e+00> : vector<8x32xf32>
    %59 = tpu.matmul %57, %58, %cst_21 {dimension_numbers = #tpu.dot_dimension_numbers<[1], [0], [0], [1], [0, 0, 1, 1], [], []>} : vector<8x8xf32>, vector<8x32xf32>, vector<8x32xf32> -> vector<8x32xf32>
    %60 = arith.addf %42, %59 : vector<8x32xf32>
    %61 = vector.extract_strided_slice %7 {offsets = [0, 24], sizes = [8, 8], strides = [1, 1]} : vector<8x96xf32> to vector<8x8xf32>
    %62 = vector.extract_strided_slice %7 {offsets = [0, 56], sizes = [8, 8], strides = [1, 1]} : vector<8x96xf32> to vector<8x8xf32>
    %63 = vector.extract_strided_slice %7 {offsets = [0, 88], sizes = [8, 8], strides = [1, 1]} : vector<8x96xf32> to vector<8x8xf32>
    %cst_22 = arith.constant dense<0.000000e+00> : vector<8x8xf32>
    %64 = tpu.matmul %61, %62, %cst_22 {dimension_numbers = #tpu.dot_dimension_numbers<[1], [1], [0], [0], [0, 0, 1, 0], [], []>} : vector<8x8xf32>, vector<8x8xf32>, vector<8x8xf32> -> vector<8x8xf32>
    %cst_23 = arith.constant dense<0xFF800000> : vector<8xf32>
    %65 = vector.multi_reduction <maximumf>, %64, %cst_23 [1] : vector<8x8xf32> to vector<8xf32>
    %66 = vector.shape_cast %65 : vector<8xf32> to vector<8x1xf32>
    %67 = vector.broadcast %66 : vector<8x1xf32> to vector<8x8xf32>
    %68 = arith.subf %64, %67 : vector<8x8xf32>
    %69 = math.exp %68 : vector<8x8xf32>
    %cst_24 = arith.constant dense<0.000000e+00> : vector<8xf32>
    %70 = vector.multi_reduction <add>, %69, %cst_24 [1] : vector<8x8xf32> to vector<8xf32>
    %71 = vector.shape_cast %70 : vector<8xf32> to vector<8x1xf32>
    %72 = tpu.reciprocal %71 : vector<8x1xf32> -> vector<8x1xf32>
    %cst_25 = arith.constant dense<0.000000e+00> : vector<8x8xf32>
    %73 = tpu.matmul %69, %63, %cst_25 {dimension_numbers = #tpu.dot_dimension_numbers<[1], [0], [0], [1], [0, 0, 1, 1], [], []>} : vector<8x8xf32>, vector<8x8xf32>, vector<8x8xf32> -> vector<8x8xf32>
    %74 = vector.broadcast %72 : vector<8x1xf32> to vector<8x8xf32>
    %75 = arith.mulf %73, %74 : vector<8x8xf32>
    %76 = vector.extract_strided_slice %6 {offsets = [24, 0], sizes = [8, 32], strides = [1, 1]} : vector<32x32xf32> to vector<8x32xf32>
    %cst_26 = arith.constant dense<0.000000e+00> : vector<8x32xf32>
    %77 = tpu.matmul %75, %76, %cst_26 {dimension_numbers = #tpu.dot_dimension_numbers<[1], [0], [0], [1], [0, 0, 1, 1], [], []>} : vector<8x8xf32>, vector<8x32xf32>, vector<8x32xf32> -> vector<8x32xf32>
    %78 = arith.addf %60, %77 : vector<8x32xf32>
    %79 = vector.extract_strided_slice %5 {offsets = [8, 0], sizes = [8, 96], strides = [1, 1]} : vector<16x96xf32> to vector<8x96xf32>
    %80 = vector.extract_strided_slice %79 {offsets = [0, 0], sizes = [8, 8], strides = [1, 1]} : vector<8x96xf32> to vector<8x8xf32>
    %81 = vector.extract_strided_slice %79 {offsets = [0, 32], sizes = [8, 8], strides = [1, 1]} : vector<8x96xf32> to vector<8x8xf32>
    %82 = vector.extract_strided_slice %79 {offsets = [0, 64], sizes = [8, 8], strides = [1, 1]} : vector<8x96xf32> to vector<8x8xf32>
    %cst_27 = arith.constant dense<0.000000e+00> : vector<8x8xf32>
    %83 = tpu.matmul %80, %81, %cst_27 {dimension_numbers = #tpu.dot_dimension_numbers<[1], [1], [0], [0], [0, 0, 1, 0], [], []>} : vector<8x8xf32>, vector<8x8xf32>, vector<8x8xf32> -> vector<8x8xf32>
    %cst_28 = arith.constant dense<0xFF800000> : vector<8xf32>
    %84 = vector.multi_reduction <maximumf>, %83, %cst_28 [1] : vector<8x8xf32> to vector<8xf32>
    %85 = vector.shape_cast %84 : vector<8xf32> to vector<8x1xf32>
    %86 = vector.broadcast %85 : vector<8x1xf32> to vector<8x8xf32>
    %87 = arith.subf %83, %86 : vector<8x8xf32>
    %88 = math.exp %87 : vector<8x8xf32>
    %cst_29 = arith.constant dense<0.000000e+00> : vector<8xf32>
    %89 = vector.multi_reduction <add>, %88, %cst_29 [1] : vector<8x8xf32> to vector<8xf32>
    %90 = vector.shape_cast %89 : vector<8xf32> to vector<8x1xf32>
    %91 = tpu.reciprocal %90 : vector<8x1xf32> -> vector<8x1xf32>
    %cst_30 = arith.constant dense<0.000000e+00> : vector<8x8xf32>
    %92 = tpu.matmul %88, %82, %cst_30 {dimension_numbers = #tpu.dot_dimension_numbers<[1], [0], [0], [1], [0, 0, 1, 1], [], []>} : vector<8x8xf32>, vector<8x8xf32>, vector<8x8xf32> -> vector<8x8xf32>
    %93 = vector.broadcast %91 : vector<8x1xf32> to vector<8x8xf32>
    %94 = arith.mulf %92, %93 : vector<8x8xf32>
    %95 = vector.extract_strided_slice %6 {offsets = [0, 0], sizes = [8, 32], strides = [1, 1]} : vector<32x32xf32> to vector<8x32xf32>
    %cst_31 = arith.constant dense<0.000000e+00> : vector<8x32xf32>
    %96 = tpu.matmul %94, %95, %cst_31 {dimension_numbers = #tpu.dot_dimension_numbers<[1], [0], [0], [1], [0, 0, 1, 1], [], []>} : vector<8x8xf32>, vector<8x32xf32>, vector<8x32xf32> -> vector<8x32xf32>
    %97 = vector.extract_strided_slice %79 {offsets = [0, 8], sizes = [8, 8], strides = [1, 1]} : vector<8x96xf32> to vector<8x8xf32>
    %98 = vector.extract_strided_slice %79 {offsets = [0, 40], sizes = [8, 8], strides = [1, 1]} : vector<8x96xf32> to vector<8x8xf32>
    %99 = vector.extract_strided_slice %79 {offsets = [0, 72], sizes = [8, 8], strides = [1, 1]} : vector<8x96xf32> to vector<8x8xf32>
    %cst_32 = arith.constant dense<0.000000e+00> : vector<8x8xf32>
    %100 = tpu.matmul %97, %98, %cst_32 {dimension_numbers = #tpu.dot_dimension_numbers<[1], [1], [0], [0], [0, 0, 1, 0], [], []>} : vector<8x8xf32>, vector<8x8xf32>, vector<8x8xf32> -> vector<8x8xf32>
    %cst_33 = arith.constant dense<0xFF800000> : vector<8xf32>
    %101 = vector.multi_reduction <maximumf>, %100, %cst_33 [1] : vector<8x8xf32> to vector<8xf32>
    %102 = vector.shape_cast %101 : vector<8xf32> to vector<8x1xf32>
    %103 = vector.broadcast %102 : vector<8x1xf32> to vector<8x8xf32>
    %104 = arith.subf %100, %103 : vector<8x8xf32>
    %105 = math.exp %104 : vector<8x8xf32>
    %cst_34 = arith.constant dense<0.000000e+00> : vector<8xf32>
    %106 = vector.multi_reduction <add>, %105, %cst_34 [1] : vector<8x8xf32> to vector<8xf32>
    %107 = vector.shape_cast %106 : vector<8xf32> to vector<8x1xf32>
    %108 = tpu.reciprocal %107 : vector<8x1xf32> -> vector<8x1xf32>
    %cst_35 = arith.constant dense<0.000000e+00> : vector<8x8xf32>
    %109 = tpu.matmul %105, %99, %cst_35 {dimension_numbers = #tpu.dot_dimension_numbers<[1], [0], [0], [1], [0, 0, 1, 1], [], []>} : vector<8x8xf32>, vector<8x8xf32>, vector<8x8xf32> -> vector<8x8xf32>
    %110 = vector.broadcast %108 : vector<8x1xf32> to vector<8x8xf32>
    %111 = arith.mulf %109, %110 : vector<8x8xf32>
    %112 = vector.extract_strided_slice %6 {offsets = [8, 0], sizes = [8, 32], strides = [1, 1]} : vector<32x32xf32> to vector<8x32xf32>
    %cst_36 = arith.constant dense<0.000000e+00> : vector<8x32xf32>
    %113 = tpu.matmul %111, %112, %cst_36 {dimension_numbers = #tpu.dot_dimension_numbers<[1], [0], [0], [1], [0, 0, 1, 1], [], []>} : vector<8x8xf32>, vector<8x32xf32>, vector<8x32xf32> -> vector<8x32xf32>
    %114 = arith.addf %96, %113 : vector<8x32xf32>
    %115 = vector.extract_strided_slice %79 {offsets = [0, 16], sizes = [8, 8], strides = [1, 1]} : vector<8x96xf32> to vector<8x8xf32>
    %116 = vector.extract_strided_slice %79 {offsets = [0, 48], sizes = [8, 8], strides = [1, 1]} : vector<8x96xf32> to vector<8x8xf32>
    %117 = vector.extract_strided_slice %79 {offsets = [0, 80], sizes = [8, 8], strides = [1, 1]} : vector<8x96xf32> to vector<8x8xf32>
    %cst_37 = arith.constant dense<0.000000e+00> : vector<8x8xf32>
    %118 = tpu.matmul %115, %116, %cst_37 {dimension_numbers = #tpu.dot_dimension_numbers<[1], [1], [0], [0], [0, 0, 1, 0], [], []>} : vector<8x8xf32>, vector<8x8xf32>, vector<8x8xf32> -> vector<8x8xf32>
    %cst_38 = arith.constant dense<0xFF800000> : vector<8xf32>
    %119 = vector.multi_reduction <maximumf>, %118, %cst_38 [1] : vector<8x8xf32> to vector<8xf32>
    %120 = vector.shape_cast %119 : vector<8xf32> to vector<8x1xf32>
    %121 = vector.broadcast %120 : vector<8x1xf32> to vector<8x8xf32>
    %122 = arith.subf %118, %121 : vector<8x8xf32>
    %123 = math.exp %122 : vector<8x8xf32>
    %cst_39 = arith.constant dense<0.000000e+00> : vector<8xf32>
    %124 = vector.multi_reduction <add>, %123, %cst_39 [1] : vector<8x8xf32> to vector<8xf32>
    %125 = vector.shape_cast %124 : vector<8xf32> to vector<8x1xf32>
    %126 = tpu.reciprocal %125 : vector<8x1xf32> -> vector<8x1xf32>
    %cst_40 = arith.constant dense<0.000000e+00> : vector<8x8xf32>
    %127 = tpu.matmul %123, %117, %cst_40 {dimension_numbers = #tpu.dot_dimension_numbers<[1], [0], [0], [1], [0, 0, 1, 1], [], []>} : vector<8x8xf32>, vector<8x8xf32>, vector<8x8xf32> -> vector<8x8xf32>
    %128 = vector.broadcast %126 : vector<8x1xf32> to vector<8x8xf32>
    %129 = arith.mulf %127, %128 : vector<8x8xf32>
    %130 = vector.extract_strided_slice %6 {offsets = [16, 0], sizes = [8, 32], strides = [1, 1]} : vector<32x32xf32> to vector<8x32xf32>
    %cst_41 = arith.constant dense<0.000000e+00> : vector<8x32xf32>
    %131 = tpu.matmul %129, %130, %cst_41 {dimension_numbers = #tpu.dot_dimension_numbers<[1], [0], [0], [1], [0, 0, 1, 1], [], []>} : vector<8x8xf32>, vector<8x32xf32>, vector<8x32xf32> -> vector<8x32xf32>
    %132 = arith.addf %114, %131 : vector<8x32xf32>
    %133 = vector.extract_strided_slice %79 {offsets = [0, 24], sizes = [8, 8], strides = [1, 1]} : vector<8x96xf32> to vector<8x8xf32>
    %134 = vector.extract_strided_slice %79 {offsets = [0, 56], sizes = [8, 8], strides = [1, 1]} : vector<8x96xf32> to vector<8x8xf32>
    %135 = vector.extract_strided_slice %79 {offsets = [0, 88], sizes = [8, 8], strides = [1, 1]} : vector<8x96xf32> to vector<8x8xf32>
    %cst_42 = arith.constant dense<0.000000e+00> : vector<8x8xf32>
    %136 = tpu.matmul %133, %134, %cst_42 {dimension_numbers = #tpu.dot_dimension_numbers<[1], [1], [0], [0], [0, 0, 1, 0], [], []>} : vector<8x8xf32>, vector<8x8xf32>, vector<8x8xf32> -> vector<8x8xf32>
    %cst_43 = arith.constant dense<0xFF800000> : vector<8xf32>
    %137 = vector.multi_reduction <maximumf>, %136, %cst_43 [1] : vector<8x8xf32> to vector<8xf32>
    %138 = vector.shape_cast %137 : vector<8xf32> to vector<8x1xf32>
    %139 = vector.broadcast %138 : vector<8x1xf32> to vector<8x8xf32>
    %140 = arith.subf %136, %139 : vector<8x8xf32>
    %141 = math.exp %140 : vector<8x8xf32>
    %cst_44 = arith.constant dense<0.000000e+00> : vector<8xf32>
    %142 = vector.multi_reduction <add>, %141, %cst_44 [1] : vector<8x8xf32> to vector<8xf32>
    %143 = vector.shape_cast %142 : vector<8xf32> to vector<8x1xf32>
    %144 = tpu.reciprocal %143 : vector<8x1xf32> -> vector<8x1xf32>
    %cst_45 = arith.constant dense<0.000000e+00> : vector<8x8xf32>
    %145 = tpu.matmul %141, %135, %cst_45 {dimension_numbers = #tpu.dot_dimension_numbers<[1], [0], [0], [1], [0, 0, 1, 1], [], []>} : vector<8x8xf32>, vector<8x8xf32>, vector<8x8xf32> -> vector<8x8xf32>
    %146 = vector.broadcast %144 : vector<8x1xf32> to vector<8x8xf32>
    %147 = arith.mulf %145, %146 : vector<8x8xf32>
    %148 = vector.extract_strided_slice %6 {offsets = [24, 0], sizes = [8, 32], strides = [1, 1]} : vector<32x32xf32> to vector<8x32xf32>
    %cst_46 = arith.constant dense<0.000000e+00> : vector<8x32xf32>
    %149 = tpu.matmul %147, %148, %cst_46 {dimension_numbers = #tpu.dot_dimension_numbers<[1], [0], [0], [1], [0, 0, 1, 1], [], []>} : vector<8x8xf32>, vector<8x32xf32>, vector<8x32xf32> -> vector<8x32xf32>
    %150 = arith.addf %132, %149 : vector<8x32xf32>
    %151 = tpu.concatenate %78, %150 in 0 : vector<8x32xf32>, vector<8x32xf32> -> vector<16x32xf32>
    %c0_47 = arith.constant 0 : index
    %c0_48 = arith.constant 0 : index
    %152 = vector.load %arg5[%c0_47, %c0_48] : memref<1x32xf32, #tpu.memory_space<vmem>>, vector<1x32xf32>
    %153 = vector.broadcast %152 : vector<1x32xf32> to vector<16x32xf32>
    %154 = arith.addf %151, %153 : vector<16x32xf32>
    %c0_49 = arith.constant 0 : index
    %c0_50 = arith.constant 0 : index
    %155 = vector.load %arg6[%c0_49, %c0_50] : memref<16x32xf32, #tpu.memory_space<vmem>>, vector<16x32xf32>
    tpu.vector_store %arg6[%c0_49, %c0_50], %154 {strides = array<i32>} : memref<16x32xf32, #tpu.memory_space<vmem>>, vector<16x32xf32>,
    return
  }
  func.func @transform_0(%arg0: i32) -> (i32, i32) {
    %c0_i32 = arith.constant 0 : i32
    %c0_i32_0 = arith.constant 0 : i32
    return %arg0, %c0_i32 : i32, i32
  }
  func.func @transform_1(%arg0: i32) -> (i32, i32) {
    %c0_i32 = arith.constant 0 : i32
    %c0_i32_0 = arith.constant 0 : i32
    %c0_i32_1 = arith.constant 0 : i32
    return %c0_i32, %c0_i32_0 : i32, i32
  }
  func.func @transform_2(%arg0: i32) -> (i32, i32) {
    %c0_i32 = arith.constant 0 : i32
    %c0_i32_0 = arith.constant 0 : i32
    %c0_i32_1 = arith.constant 0 : i32
    return %c0_i32, %c0_i32_0 : i32, i32
  }
  func.func @transform_3(%arg0: i32) -> (i32, i32) {
    %c0_i32 = arith.constant 0 : i32
    %c0_i32_0 = arith.constant 0 : i32
    %c0_i32_1 = arith.constant 0 : i32
    return %c0_i32, %c0_i32_0 : i32, i32
  }
  func.func @transform_4(%arg0: i32) -> (i32, i32) {
    %c0_i32 = arith.constant 0 : i32
    %c0_i32_0 = arith.constant 0 : i32
    %c0_i32_1 = arith.constant 0 : i32
    return %c0_i32, %c0_i32_0 : i32, i32
  }
  func.func @transform_5(%arg0: i32) -> (i32, i32) {
    %c0_i32 = arith.constant 0 : i32
    %c0_i32_0 = arith.constant 0 : i32
    return %arg0, %c0_i32 : i32, i32
  }
}

</mosaic_0001>

<bundles_post_ra>
// kernel: tpu_custom_call.1
= control target key start
LH: loop header
LB: loop body
LE: loop exit
PB: predicated region body
PF: predicated region fallthrough
CT: control target
= control target key end

     0   :  { %10 = vsyncpa [#allocation3], 0  ;;  %s2731_s0 = inlined_call_operand.hbm [shape: f32[16,32], index: 0, kind: input, shape index: {}]   ;;  %s2732_s1 = inlined_call_operand.hbm [shape: f32[32,96], index: 1, kind: input, shape index: {}]   ;;  %s2733_s2 = inlined_call_operand.vmem [shape: f32[1,96], index: 2, kind: input, shape index: {}]   ;;  %s2734_s3 = inlined_call_operand.hbm [shape: f32[32,32], index: 3, kind: input, shape index: {}]   ;;  %s2735_s4 = inlined_call_operand.vmem [shape: f32[1,32], index: 4, kind: input, shape index: {}]   ;;  %s2736_s5 = inlined_call_operand.hbm [shape: f32[16,32], index: 5, kind: output, shape index: {}]  }
   0x1   :  { %11 = vsyncpa [#allocation6], 0 }
   0x2   :  { %12 = vsyncpa [#allocation4], 0  ;;  %s2455_s18 = smov [#allocation5]   ;;  %s2456_s20 = smov [#allocation2]  }
   0x3   :  { %s30_s19 = sshll.u32 %s2455_s18, 4  ;;  %s18_s21 = sshll.u32 %s2456_s20, 4  ;;  %s31_s19 = int_to_ptr.vmem [resolvable:$true] %s30_s19  ;;  %s19_s21 = int_to_ptr.vmem [resolvable:$true] %s18_s21 }
   0x4   :  { %s2377_s22 = scalar_lea.vmem %s31_s19, 512  ;;  %p2382_p1 = scmp.lt.s32.totalorder %s31_s19, %s31_s19 }
   0x5   :  { %p2378_p0 = scmp.ne.s32.totalorder %s31_s19, %s2377_s22  ;;  %p2383_p2 = scmp.lt.s32.totalorder %s2377_s22, %s2377_s22 }
   0x7   :  { %p2384_p3 = por %p2383_p2, %p2382_p1 }
   0x9   :  { %p2385_p4 = pnand %p2384_p3, %p2378_p0 }
   0xb   :  { %2388 = shalt.err (!%p2385_p4)
}
   0xc   :  { %s2457_s23 = smov 128   ;;  %s2458_s24 = smov 8  }
   0xd   :  { %36 = dma.hbm_to_vmem [thread:$0]  %s2732_s1, 512, %s31_s19, [#allocation6], %s2457_s23, %s2457_s23, %s2458_s24  }
   0xe   :  { %s2397_s27 = scalar_lea.vmem %s19_s21, 256  ;;  %p2402_p6 = scmp.lt.s32.totalorder %s19_s21, %s19_s21 }
   0xf   :  { %p2398_p5 = scmp.ne.s32.totalorder %s19_s21, %s2397_s27  ;;  %p2403_p7 = scmp.lt.s32.totalorder %s2397_s27, %s2397_s27 }
  0x11   :  { %p2404_p8 = por %p2403_p7, %p2402_p6 }
  0x13   :  { %p2405_p9 = pnand %p2404_p8, %p2398_p5 }
  0x15   :  { %2408 = shalt.err (!%p2405_p9)
}
  0x16   :  { %24 = dma.hbm_to_vmem [thread:$0]  %s2731_s0, 256, %s19_s21, [#allocation3], %s2457_s23, %s2457_s23, %s2458_s24  }
  0x17   :  { %s2459_s30 = smov [#allocation7]  }
  0x18   :  { %s44_s6 = sshll.u32 %s2459_s30, 4  ;;  %s45_s6 = int_to_ptr.vmem [resolvable:$true] %s44_s6 }
  0x19   :  { %s2417_s7 = scalar_lea.vmem %s45_s6, 512  ;;  %p2422_p11 = scmp.lt.s32.totalorder %s45_s6, %s45_s6 }
  0x1a   :  { %p2418_p10 = scmp.ne.s32.totalorder %s45_s6, %s2417_s7  ;;  %p2423_p12 = scmp.lt.s32.totalorder %s2417_s7, %s2417_s7 }
  0x1c   :  { %p2424_p13 = por %p2423_p12, %p2422_p11 }
  0x1e   :  { %p2425_p0 = pnand %p2424_p13, %p2418_p10 }
  0x20   :  { %2428 = shalt.err (!%p2425_p0)
}
  0x21   :  { %50 = dma.hbm_to_vmem [thread:$0]  %s2734_s3, 512, %s45_s6, [#allocation6], %s2457_s23, %s2457_s23, %s2458_s24  }
  0x22   :  { %2449 = dma.done.wait [#allocation3], 256  }
  0x23   :  { %2450 = vsyncadd [#allocation3], 4294967040 }
  0x24   :  { %2451 = dma.done.wait [#allocation6], 1024  }
  0x25   :  { %2452 = vsyncadd [#allocation6], 4294966272  ;;  %vm75_vm0 = vcmask 261120   ;;  %v67_v0 = vld [vmem:[#allocation5 + $0x18] sm:$0xff]  ;;  %v66_v1 = vld [vmem:[#allocation5 + $0x10] sm:$0xff]  ;;  %v2460_v6 = vmov 0.0  }
  0x26   :  { %2187 = vmatprep.subr.mxu0 %v67_v0  ;;  %v62_v2 = vld [vmem:[#allocation2] sm:$0xff]  ;;  %v65_v3 = vld [vmem:[#allocation5 + $0x8] sm:$0xff]  ;;  %v64_v4 = vld [vmem:[#allocation5] sm:$0xff]  ;;  %2198 = vmatprep.subr.mxu1 %v2460_v6  ;;  %vm2461_vm1 = vmmov 0   ;;  %s2462_s9 = smov 120   ;;  %s2463_s10 = smov 96  }
  0x27   :  { %2188 = vmatpush3.msra.mxu0 %v67_v0  ;;  %2195 = vmatprep.mubr.msk.f32.mxu0 %vm75_vm0, %v62_v2  ;;  %v63_v5 = vld [vmem:[#allocation2 + $0x8] sm:$0xff]  ;;  %v2097_v7 = vld [vmem:[%s2733_s2] ss:$0 sm:$0xff]  ;;  %s2464_s11 = smov 88   ;;  %vm164_vm2 = vcmask 64512   ;;  %s2465_s2 = smov 56  }
  0x28   :  { %2189 = vmatprep.subr.mxu0 %v66_v1  ;;  %2200 = vmatprep.mubr.msk.f32.mxu1 %vm2461_vm1, %v2460_v6  ;;  %s2466_s12 = smov 64   ;;  %s2467_s13 = smov 80   ;;  %v2578_v33 = vld [vmem:[#allocation7] sm:$0xff]  ;;  %v2582_v34 = vld [vmem:[#allocation7 + $0x8] sm:$0xff]  ;;  %v2616_v63 = vld [vmem:[#allocation7 + $0x10] sm:$0xff] }
  0x29   :  { %2190 = vmatpush3.msra.mxu0 %v66_v1  ;;  %s2468_s14 = smov 112   ;;  %s2469_s15 = smov 48  }
  0x2a   :  { %2191 = vmatprep.subr.mxu0 %v65_v3  ;;  %s2470_s16 = smov 72   ;;  %s2471_s17 = smov 104  }
  0x2b   :  { %2192 = vmatpush3.msra.mxu0 %v65_v3  ;;  %s2472_s18 = smov 40  }
  0x2c   :  { %2193 = vmatprep.subr.mxu0 %v64_v4 }
  0x2d   :  { %2194 = vmatpush3.msra.mxu0 %v64_v4 }
  0x2e   :  { %2196 = vmatmul.mubr.msk.f32.vlgmr.msra.gmra.mxu0 %vm75_vm0, %v63_v5  ;;  %2208 = vmatprep.subr.mxu0 %v2460_v6 }
  0x2f   :  { %2210 = vmatprep.mubr.msk.f32.mxu0 %vm2461_vm1, %v2460_v6 }
  0xee   :  { %v2197_v8 = vpop.f32.mrf.mxu0 }
  0xef   :  { %v2533_v9 = vadd.f32 %v2197_v8, %v2097_v7 }
  0xf0   :  { %v148_v10 = vpop.f32.mrf.mxu0 }
  0xf1   :  { %v2535_v11 = vadd.f32 %v2097_v7, %v148_v10 }
  0xf3   :  { %326 = vrot.lane.b32.xlu1 %v2535_v11, %s2462_s9  ;;  %162 = vrot.lane.b32.xlu0 %v2535_v11, %s2463_s10 }
  0xf7   :  { %328 = vrot.lane.b32.xlu0 %v2535_v11, %s2464_s11 }
 0x165   :  { %v163_v12 = vpop.permute.xlu0 %162  ;;  %v327_v14 = vpop.permute.xlu1 %326 }
 0x166   :  { %2199 = vmatpush3.xpose.msk.msra.mxu1 %vm164_vm2, %v163_v12 }
 0x167   :  { %2203 = vmatprep.subr.mxu1 %v2460_v6 }
 0x169   :  { %2201 = vmatmul.mubr.msk.f32.vlgmr.msra.gmra.mxu1 %vm164_vm2, %v2535_v11  ;;  %v329_v13 = vpop.permute.xlu0 %328 }
 0x16a   :  { %2209 = vmatpush3.xpose.msk.msra.mxu0 %vm164_vm2, %v329_v13  ;;  %2205 = vmatprep.mubr.msk.f32.mxu1 %vm2461_vm1, %v2460_v6 }
 0x16b   :  { %2218 = vmatprep.subr.mxu0 %v2460_v6 }
 0x16d   :  { %2211 = vmatmul.mubr.msk.f32.vlgmr.msra.gmra.mxu0 %vm164_vm2, %v327_v14 }
 0x16e   :  { %2220 = vmatprep.mubr.msk.f32.mxu0 %vm2461_vm1, %v2460_v6  ;;  %2219 = vmatpush3.msra.mxu0 %v2582_v34 }
 0x16f   :  { %2228 = vmatprep.subr.mxu0 %v2460_v6 }
 0x229   :  { %v235_v15 = vpop.f32.mrf.mxu1 }
 0x22a   :  { %v239_v16 = vsel %vm164_vm2, %v235_v15, -inf }
 0x22b   :  { %240 = vmax.xlane.f32.xlu1 %v239_v16  ;;  %v2202_v17 = vpop.f32.mrf.mxu1 }
 0x22d   :  { %v400_v18 = vpop.f32.mrf.mxu0 }
 0x22e   :  { %v404_v19 = vsel %vm164_vm2, %v400_v18, -inf }
 0x22f   :  { %405 = vmax.xlane.f32.xlu0 %v404_v19  ;;  %v2212_v20 = vpop.f32.mrf.mxu0 }
 0x23c   :  { %414 = vrot.lane.b32.xlu1 %v2535_v11, %s2465_s2 }
 0x245   :  { %249 = vrot.lane.b32.xlu0 %v2535_v11, %s2466_s12 }
 0x249   :  { %639 = vrot.lane.b32.xlu0 %v2535_v11, %s2467_s13 }
 0x24d   :  { %637 = vrot.lane.b32.xlu0 %v2535_v11, %s2468_s14 }
 0x2b4   :  { %v241_v21 = vpop.xlane.xlu1 %240 }
 0x2b5   :  { %v242_v22 = vsub.f32 %v235_v15, %v241_v21 }
 0x2b7   :  { %v243_v23 = vmul.f32 1.442695, %v242_v22  ;;  %v2649_v22 = vld [vmem:[#allocation7 + $0x18] sm:$0xff] }
 0x2b8   :  { %v406_v24 = vpop.xlane.xlu0 %405  ;;  %v415_v29 = vpop.permute.xlu1 %414 }
 0x2b9   :  { %2337 = vpow2.f32 %v243_v23  ;;  %v407_v25 = vsub.f32 %v400_v18, %v406_v24 }
 0x2bb   :  { %v408_v26 = vmul.f32 1.442695, %v407_v25 }
 0x2bc   :  { %v250_v27 = vpop.permute.xlu0 %249 }
 0x2bd   :  { %2339 = vpow2.f32 %v408_v26  ;;  %2204 = vmatpush3.msra.mxu1 %v250_v27 }
 0x2be   :  { %2213 = vmatprep.subr.mxu1 %v2460_v6 }
 0x2c0   :  { %v640_v35 = vpop.permute.xlu0 %639 }
 0x2c4   :  { %v638_v36 = vpop.permute.xlu0 %637 }
 0x2c6   :  { %v2338_v28 = vpop.eup %2337 }
 0x2c7   :  { %2206 = vmatmul.mubr.msk.f32.vlgmr.msra.gmra.mxu1 %vm164_vm2, %v2338_v28  ;;  %v245_v30 = vsel %vm164_vm2, %v2338_v28, 0.0 }
 0x2c8   :  { %2214 = vmatpush3.msra.mxu1 %v415_v29  ;;  %246 = vadd.xlane.f32.xlu0 %v245_v30 }
 0x2c9   :  { %2215 = vmatprep.mubr.msk.f32.mxu1 %vm2461_vm1, %v2460_v6  ;;  %2223 = vmatprep.subr.mxu1 %v2460_v6 }
 0x2ca   :  { %v2340_v31 = vpop.eup %2339 }
 0x2cb   :  { %2216 = vmatmul.mubr.msk.f32.vlgmr.msra.gmra.mxu1 %vm164_vm2, %v2340_v31  ;;  %v410_v32 = vsel %vm164_vm2, %v2340_v31, 0.0 }
 0x2cc   :  { %411 = vadd.xlane.f32.xlu1 %v410_v32  ;;  %2225 = vmatprep.mubr.msk.f32.mxu1 %vm2461_vm1, %v2460_v6 }
 0x2cd   :  { %2224 = vmatpush3.msra.mxu1 %v2578_v33 }
 0x2ce   :  { %2233 = vmatprep.subr.mxu1 %v2460_v6 }
 0x2dd   :  { %725 = vrot.lane.b32.xlu1 %v2535_v11, %s2469_s15 }
 0x2de   :  { %878 = vrot.lane.b32.xlu0 %v2535_v11, %s2470_s16 }
 0x351   :  { %v247_v37 = vpop.xlane.xlu0 %246 }
 0x352   :  { %2341 = vrcp.f32 %v247_v37 }
 0x355   :  { %v412_v38 = vpop.xlane.xlu1 %411  ;;  %v879_v60 = vpop.permute.xlu0 %878 }
 0x356   :  { %2343 = vrcp.f32 %v412_v38 }
 0x359   :  { %v726_v43 = vpop.permute.xlu1 %725 }
 0x35f   :  { %v2342_v39 = vpop.eup %2341 }
 0x363   :  { %v2344_v44 = vpop.eup %2343 }
 0x387   :  { %v321_v40 = vpop.f32.mrf.mxu1 }
 0x388   :  { %v325_v41 = vmul.f32 %v2342_v39, %v321_v40 }
 0x389   :  { %v2207_v42 = vpop.f32.mrf.mxu1 }
 0x38a   :  { %2226 = vmatmul.mubr.msk.f32.vlgmr.msra.gmra.mxu1 %vm164_vm2, %v325_v41 }
 0x38b   :  { %2234 = vmatpush3.msra.mxu1 %v726_v43  ;;  %v486_v45 = vpop.f32.mrf.mxu1  ;;  %2235 = vmatprep.mubr.msk.f32.mxu1 %vm2461_vm1, %v2460_v6 }
 0x38c   :  { %v490_v46 = vmul.f32 %v2344_v44, %v486_v45  ;;  %2243 = vmatprep.subr.mxu1 %v2460_v6 }
 0x38d   :  { %v2217_v47 = vpop.f32.mrf.mxu1 }
 0x38e   :  { %2221 = vmatmul.mubr.msk.f32.vlgmr.msra.gmra.mxu0 %vm164_vm2, %v490_v46 }
 0x38f   :  { %2229 = vmatpush3.xpose.msk.msra.mxu0 %vm164_vm2, %v640_v35  ;;  %2230 = vmatprep.mubr.msk.f32.mxu0 %vm2461_vm1, %v2460_v6 }
 0x390   :  { %2238 = vmatprep.subr.mxu0 %v2460_v6 }
 0x392   :  { %2231 = vmatmul.mubr.msk.f32.vlgmr.msra.gmra.mxu0 %vm164_vm2, %v638_v36 }
 0x393   :  { %2240 = vmatprep.mubr.msk.f32.mxu0 %vm2461_vm1, %v2460_v6  ;;  %2239 = vmatpush3.msra.mxu0 %v2616_v63 }
 0x394   :  { %2248 = vmatprep.subr.mxu0 %v2460_v6 }
 0x44a   :  { %v633_v48 = vpop.f32.mrf.mxu1 }
 0x44c   :  { %v2227_v49 = vpop.f32.mrf.mxu1 }
 0x44e   :  { %v560_v50 = vpop.f32.mrf.mxu0 }
 0x44f   :  { %v2598_v51 = vadd.f32 %v633_v48, %v560_v50  ;;  %v2683_v48 = vld [vmem:[%s2735_s4] ss:$0 sm:$0xff]  ;;  %s2473_s4 = smov [#allocation8]  }
 0x450   :  { %v2222_v52 = vpop.f32.mrf.mxu0  ;;  %s2084_s21 = sshll.u32 %s2473_s4, 4  ;;  %s2085_s21 = int_to_ptr.vmem [resolvable:$true] %s2084_s21 }
 0x451   :  { %s2429_s22 = scalar_lea.vmem %s2085_s21, 256  ;;  %p2434_p2 = scmp.lt.s32.totalorder %s2085_s21, %s2085_s21 }
 0x452   :  { %v711_v53 = vpop.f32.mrf.mxu0  ;;  %p2430_p1 = scmp.ne.s32.totalorder %s2085_s21, %s2429_s22  ;;  %p2435_p3 = scmp.lt.s32.totalorder %s2429_s22, %s2429_s22 }
 0x453   :  { %v715_v54 = vsel %vm164_vm2, %v711_v53, -inf }
 0x454   :  { %716 = vmax.xlane.f32.xlu1 %v715_v54  ;;  %v2232_v55 = vpop.f32.mrf.mxu0  ;;  %p2436_p4 = por %p2435_p3, %p2434_p2 }
 0x456   :  { %p2437_p5 = pnand %p2436_p4, %p2430_p1 }
 0x465   :  { %876 = vrot.lane.b32.xlu1 %v2535_v11, %s2471_s17 }
 0x4dd   :  { %v717_v56 = vpop.xlane.xlu1 %716 }
 0x4de   :  { %v718_v57 = vsub.f32 %v711_v53, %v717_v56 }
 0x4e0   :  { %v719_v58 = vmul.f32 1.442695, %v718_v57 }
 0x4e1   :  { %v877_v62 = vpop.permute.xlu1 %876 }
 0x4e2   :  { %2345 = vpow2.f32 %v719_v58 }
 0x4ef   :  { %v2346_v59 = vpop.eup %2345 }
 0x4f0   :  { %2236 = vmatmul.mubr.msk.f32.vlgmr.msra.gmra.mxu1 %vm164_vm2, %v2346_v59  ;;  %v721_v61 = vsel %vm164_vm2, %v2346_v59, 0.0 }
 0x4f1   :  { %2244 = vmatpush3.xpose.msk.msra.mxu1 %vm164_vm2, %v879_v60  ;;  %722 = vadd.xlane.f32.xlu1 %v721_v61 }
 0x4f2   :  { %2245 = vmatprep.mubr.msk.f32.mxu1 %vm2461_vm1, %v2460_v6  ;;  %2253 = vmatprep.subr.mxu1 %v2460_v6 }
 0x4f4   :  { %2246 = vmatmul.mubr.msk.f32.vlgmr.msra.gmra.mxu1 %vm164_vm2, %v877_v62 }
 0x4f5   :  { %2255 = vmatprep.mubr.msk.f32.mxu1 %vm2461_vm1, %v2460_v6  ;;  %2254 = vmatpush3.msra.mxu1 %v2649_v22 }
 0x4f6   :  { %2263 = vmatprep.subr.mxu1 %v2460_v6 }
 0x502   :  { %1116 = vrot.lane.b32.xlu1 %v2533_v9, %s2463_s10 }
 0x506   :  { %1281 = vrot.lane.b32.xlu1 %v2533_v9, %s2464_s11 }
 0x57a   :  { %v723_v0 = vpop.xlane.xlu1 %722 }
 0x57b   :  { %2347 = vrcp.f32 %v723_v0 }
 0x57e   :  { %v1117_v15 = vpop.permute.xlu1 %1116 }
 0x588   :  { %v2348_v1 = vpop.eup %2347 }
 0x5b0   :  { %v797_v2 = vpop.f32.mrf.mxu1 }
 0x5b1   :  { %v801_v3 = vmul.f32 %v2348_v1, %v797_v2 }
 0x5b2   :  { %v2237_v4 = vpop.f32.mrf.mxu1 }
 0x5b3   :  { %2241 = vmatmul.mubr.msk.f32.vlgmr.msra.gmra.mxu0 %vm164_vm2, %v801_v3 }
 0x5b4   :  { %v950_v5 = vpop.f32.mrf.mxu1  ;;  %2250 = vmatprep.mubr.msk.f32.mxu0 %vm2461_vm1, %v2460_v6 }
 0x5b5   :  { %v954_v7 = vsel %vm164_vm2, %v950_v5, -inf }
 0x5b6   :  { %955 = vmax.xlane.f32.xlu0 %v954_v7  ;;  %v2247_v8 = vpop.f32.mrf.mxu1 }
 0x5cc   :  { %964 = vrot.lane.b32.xlu0 %v2535_v11, %s2472_s18  ;;  %v1282_v11 = vpop.permute.xlu1 %1281 }
 0x5d0   :  { %1279 = vrot.lane.b32.xlu0 %v2533_v9, %s2462_s9 }
 0x63f   :  { %v956_v10 = vpop.xlane.xlu0 %955 }
 0x640   :  { %v957_v12 = vsub.f32 %v950_v5, %v956_v10 }
 0x642   :  { %v958_v13 = vmul.f32 1.442695, %v957_v12 }
 0x643   :  { %v965_v14 = vpop.permute.xlu0 %964 }
 0x644   :  { %2349 = vpow2.f32 %v958_v13  ;;  %2249 = vmatpush3.msra.mxu0 %v965_v14 }
 0x645   :  { %2258 = vmatprep.subr.mxu0 %v2460_v6 }
 0x647   :  { %v1280_v18 = vpop.permute.xlu0 %1279 }
 0x651   :  { %v2350_v16 = vpop.eup %2349 }
 0x652   :  { %2251 = vmatmul.mubr.msk.f32.vlgmr.msra.gmra.mxu0 %vm164_vm2, %v2350_v16  ;;  %v960_v17 = vsel %vm164_vm2, %v2350_v16, 0.0 }
 0x653   :  { %2259 = vmatpush3.xpose.msk.msra.mxu0 %vm164_vm2, %v1117_v15  ;;  %961 = vadd.xlane.f32.xlu1 %v960_v17 }
 0x654   :  { %2260 = vmatprep.mubr.msk.f32.mxu0 %vm2461_vm1, %v2460_v6  ;;  %2268 = vmatprep.subr.mxu0 %v2460_v6 }
 0x656   :  { %2261 = vmatmul.mubr.msk.f32.vlgmr.msra.gmra.mxu0 %vm164_vm2, %v2533_v9 }
 0x657   :  { %2269 = vmatpush3.xpose.msk.msra.mxu0 %vm164_vm2, %v1282_v11  ;;  %2270 = vmatprep.mubr.msk.f32.mxu0 %vm2461_vm1, %v2460_v6 }
 0x658   :  { %2278 = vmatprep.subr.mxu0 %v2460_v6 }
 0x65a   :  { %2271 = vmatmul.mubr.msk.f32.vlgmr.msra.gmra.mxu0 %vm164_vm2, %v1280_v18 }
 0x65b   :  { %2279 = vmatpush3.msra.mxu0 %v2582_v34  ;;  %2280 = vmatprep.mubr.msk.f32.mxu0 %vm2461_vm1, %v2460_v6 }
 0x65c   :  { %2288 = vmatprep.subr.mxu0 %v2460_v6 }
 0x664   :  { %1202 = vrot.lane.b32.xlu1 %v2533_v9, %s2466_s12 }
 0x673   :  { %v871_v19 = vpop.f32.mrf.mxu0 }
 0x674   :  { %v875_v20 = vadd.f32 %v871_v19, %v2598_v51 }
 0x675   :  { %v2242_v21 = vpop.f32.mrf.mxu0 }
 0x6dc   :  { %v962_v23 = vpop.xlane.xlu1 %961 }
 0x6dd   :  { %2351 = vrcp.f32 %v962_v23 }
 0x6e0   :  { %v1203_v28 = vpop.permute.xlu1 %1202 }
 0x6ea   :  { %v2352_v24 = vpop.eup %2351 }
 0x712   :  { %v1036_v25 = vpop.f32.mrf.mxu0 }
 0x713   :  { %v1040_v26 = vmul.f32 %v2352_v24, %v1036_v25 }
 0x714   :  { %v2252_v27 = vpop.f32.mrf.mxu0 }
 0x715   :  { %2256 = vmatmul.mubr.msk.f32.vlgmr.msra.gmra.mxu1 %vm164_vm2, %v1040_v26 }
 0x716   :  { %2264 = vmatpush3.msra.mxu1 %v1203_v28  ;;  %v1188_v29 = vpop.f32.mrf.mxu0  ;;  %2265 = vmatprep.mubr.msk.f32.mxu1 %vm2461_vm1, %v2460_v6 }
 0x717   :  { %v1192_v30 = vsel %vm164_vm2, %v1188_v29, -inf  ;;  %2273 = vmatprep.subr.mxu1 %v2460_v6 }
 0x718   :  { %1193 = vmax.xlane.f32.xlu0 %v1192_v30  ;;  %v2262_v31 = vpop.f32.mrf.mxu0 }
 0x71a   :  { %v1353_v32 = vpop.f32.mrf.mxu0 }
 0x71b   :  { %v1357_v34 = vsel %vm164_vm2, %v1353_v32, -inf }
 0x71c   :  { %1358 = vmax.xlane.f32.xlu0 %v1357_v34  ;;  %v2272_v35 = vpop.f32.mrf.mxu0 }
 0x732   :  { %1367 = vrot.lane.b32.xlu0 %v2533_v9, %s2465_s2 }
 0x736   :  { %1592 = vrot.lane.b32.xlu0 %v2533_v9, %s2467_s13 }
 0x73a   :  { %1590 = vrot.lane.b32.xlu0 %v2533_v9, %s2468_s14 }
 0x7a1   :  { %v1194_v36 = vpop.xlane.xlu0 %1193 }
 0x7a2   :  { %v1195_v37 = vsub.f32 %v1188_v29, %v1194_v36 }
 0x7a4   :  { %v1196_v38 = vmul.f32 1.442695, %v1195_v37 }
 0x7a5   :  { %v1359_v39 = vpop.xlane.xlu0 %1358 }
 0x7a6   :  { %2353 = vpow2.f32 %v1196_v38  ;;  %v1360_v40 = vsub.f32 %v1353_v32, %v1359_v39 }
 0x7a8   :  { %v1361_v41 = vmul.f32 1.442695, %v1360_v40 }
 0x7a9   :  { %v1368_v43 = vpop.permute.xlu0 %1367 }
 0x7aa   :  { %2355 = vpow2.f32 %v1361_v41 }
 0x7ad   :  { %v1593_v51 = vpop.permute.xlu0 %1592 }
 0x7b1   :  { %v1591_v52 = vpop.permute.xlu0 %1590 }
 0x7b3   :  { %v2354_v42 = vpop.eup %2353 }
 0x7b4   :  { %2266 = vmatmul.mubr.msk.f32.vlgmr.msra.gmra.mxu1 %vm164_vm2, %v2354_v42  ;;  %v1198_v44 = vsel %vm164_vm2, %v2354_v42, 0.0 }
 0x7b5   :  { %2274 = vmatpush3.msra.mxu1 %v1368_v43  ;;  %1199 = vadd.xlane.f32.xlu0 %v1198_v44 }
 0x7b6   :  { %2275 = vmatprep.mubr.msk.f32.mxu1 %vm2461_vm1, %v2460_v6  ;;  %2283 = vmatprep.subr.mxu1 %v2460_v6 }
 0x7b7   :  { %v2356_v45 = vpop.eup %2355 }
 0x7b8   :  { %2276 = vmatmul.mubr.msk.f32.vlgmr.msra.gmra.mxu1 %vm164_vm2, %v2356_v45  ;;  %v1363_v46 = vsel %vm164_vm2, %v2356_v45, 0.0 }
 0x7b9   :  { %1364 = vadd.xlane.f32.xlu1 %v1363_v46  ;;  %2284 = vmatpush3.msra.mxu1 %v2578_v33 }
 0x7ba   :  { %2285 = vmatprep.mubr.msk.f32.mxu1 %vm2461_vm1, %v2460_v6  ;;  %2293 = vmatprep.subr.mxu1 %v2460_v6 }
 0x7ca   :  { %1678 = vrot.lane.b32.xlu1 %v2533_v9, %s2469_s15 }
 0x7cb   :  { %1831 = vrot.lane.b32.xlu0 %v2533_v9, %s2470_s16 }
 0x7d5   :  { %v1110_v47 = vpop.f32.mrf.mxu1 }
 0x7d6   :  { %v1114_v49 = vadd.f32 %v1110_v47, %v875_v20 }
 0x7d7   :  { %v2257_v50 = vpop.f32.mrf.mxu1 }
 0x7d8   :  { %v2075_v33 = vadd.f32 %v2683_v48, %v1114_v49 }
 0x7da   :  { %2077 = vst.msk [vmem:[#allocation8] sm:$0xff] %vm75_vm0, %v2075_v33 }
 0x83e   :  { %v1200_v53 = vpop.xlane.xlu0 %1199 }
 0x83f   :  { %2357 = vrcp.f32 %v1200_v53 }
 0x842   :  { %v1365_v54 = vpop.xlane.xlu1 %1364  ;;  %v1832_v15 = vpop.permute.xlu0 %1831 }
 0x843   :  { %2359 = vrcp.f32 %v1365_v54 }
 0x846   :  { %v1679_v59 = vpop.permute.xlu1 %1678 }
 0x84c   :  { %v2358_v55 = vpop.eup %2357 }
 0x850   :  { %v2360_v60 = vpop.eup %2359 }
 0x874   :  { %v1274_v56 = vpop.f32.mrf.mxu1 }
 0x875   :  { %v1278_v57 = vmul.f32 %v2358_v55, %v1274_v56 }
 0x876   :  { %v2267_v58 = vpop.f32.mrf.mxu1 }
 0x877   :  { %2286 = vmatmul.mubr.msk.f32.vlgmr.msra.gmra.mxu1 %vm164_vm2, %v1278_v57 }
 0x878   :  { %2294 = vmatpush3.msra.mxu1 %v1679_v59  ;;  %v1439_v61 = vpop.f32.mrf.mxu1  ;;  %2295 = vmatprep.mubr.msk.f32.mxu1 %vm2461_vm1, %v2460_v6 }
 0x879   :  { %v1443_v62 = vmul.f32 %v2360_v60, %v1439_v61  ;;  %2303 = vmatprep.subr.mxu1 %v2460_v6 }
 0x87a   :  { %v2277_v0 = vpop.f32.mrf.mxu1 }
 0x87b   :  { %2281 = vmatmul.mubr.msk.f32.vlgmr.msra.gmra.mxu0 %vm164_vm2, %v1443_v62 }
 0x87c   :  { %2289 = vmatpush3.xpose.msk.msra.mxu0 %vm164_vm2, %v1593_v51  ;;  %2290 = vmatprep.mubr.msk.f32.mxu0 %vm2461_vm1, %v2460_v6 }
 0x87d   :  { %2298 = vmatprep.subr.mxu0 %v2460_v6 }
 0x87f   :  { %2291 = vmatmul.mubr.msk.f32.vlgmr.msra.gmra.mxu0 %vm164_vm2, %v1591_v52 }
 0x880   :  { %2299 = vmatpush3.msra.mxu0 %v2616_v63  ;;  %2300 = vmatprep.mubr.msk.f32.mxu0 %vm2461_vm1, %v2460_v6 }
 0x881   :  { %2308 = vmatprep.subr.mxu0 %v2460_v6 }
 0x937   :  { %v1586_v1 = vpop.f32.mrf.mxu1 }
 0x939   :  { %v2287_v2 = vpop.f32.mrf.mxu1 }
 0x93b   :  { %v1513_v3 = vpop.f32.mrf.mxu0 }
 0x93c   :  { %v1587_v4 = vadd.f32 %v1586_v1, %v1513_v3 }
 0x93d   :  { %v2282_v5 = vpop.f32.mrf.mxu0 }
 0x93f   :  { %v1664_v7 = vpop.f32.mrf.mxu0 }
 0x940   :  { %v1668_v8 = vsel %vm164_vm2, %v1664_v7, -inf }
 0x941   :  { %1669 = vmax.xlane.f32.xlu1 %v1668_v8  ;;  %v2292_v10 = vpop.f32.mrf.mxu0 }
 0x952   :  { %1829 = vrot.lane.b32.xlu1 %v2533_v9, %s2471_s17 }
 0x9ca   :  { %v1670_v12 = vpop.xlane.xlu1 %1669 }
 0x9cb   :  { %v1671_v63 = vsub.f32 %v1664_v7, %v1670_v12 }
 0x9cd   :  { %v1672_v13 = vmul.f32 1.442695, %v1671_v63 }
 0x9ce   :  { %v1830_v17 = vpop.permute.xlu1 %1829 }
 0x9cf   :  { %2361 = vpow2.f32 %v1672_v13 }
 0x9dc   :  { %v2362_v14 = vpop.eup %2361 }
 0x9dd   :  { %2296 = vmatmul.mubr.msk.f32.vlgmr.msra.gmra.mxu1 %vm164_vm2, %v2362_v14  ;;  %v1674_v16 = vsel %vm164_vm2, %v2362_v14, 0.0 }
 0x9de   :  { %2304 = vmatpush3.xpose.msk.msra.mxu1 %vm164_vm2, %v1832_v15  ;;  %1675 = vadd.xlane.f32.xlu1 %v1674_v16 }
 0x9df   :  { %2305 = vmatprep.mubr.msk.f32.mxu1 %vm2461_vm1, %v2460_v6  ;;  %2313 = vmatprep.subr.mxu1 %v2460_v6 }
 0x9e1   :  { %2306 = vmatmul.mubr.msk.f32.vlgmr.msra.gmra.mxu1 %vm164_vm2, %v1830_v17 }
 0x9e2   :  { %2314 = vmatpush3.msra.mxu1 %v2649_v22  ;;  %2315 = vmatprep.mubr.msk.f32.mxu1 %vm2461_vm1, %v2460_v6 }
 0x9ef   :  { %1917 = vrot.lane.b32.xlu1 %v2533_v9, %s2472_s18 }
 0xa67   :  { %v1676_v11 = vpop.xlane.xlu1 %1675 }
 0xa68   :  { %2363 = vrcp.f32 %v1676_v11 }
 0xa6b   :  { %v1918_v23 = vpop.permute.xlu1 %1917 }
 0xa75   :  { %v2364_v18 = vpop.eup %2363 }
 0xa9d   :  { %v1750_v19 = vpop.f32.mrf.mxu1 }
 0xa9e   :  { %v1754_v20 = vmul.f32 %v2364_v18, %v1750_v19 }
 0xa9f   :  { %v2297_v21 = vpop.f32.mrf.mxu1 }
 0xaa0   :  { %2301 = vmatmul.mubr.msk.f32.vlgmr.msra.gmra.mxu0 %vm164_vm2, %v1754_v20 }
 0xaa1   :  { %2309 = vmatpush3.msra.mxu0 %v1918_v23  ;;  %v1903_v24 = vpop.f32.mrf.mxu1  ;;  %2310 = vmatprep.mubr.msk.f32.mxu0 %vm2461_vm1, %v2460_v6 }
 0xaa2   :  { %v1907_v22 = vsel %vm164_vm2, %v1903_v24, -inf }
 0xaa3   :  { %1908 = vmax.xlane.f32.xlu0 %v1907_v22  ;;  %v2307_v25 = vpop.f32.mrf.mxu1 }
 0xb2c   :  { %v1909_v26 = vpop.xlane.xlu0 %1908 }
 0xb2d   :  { %v1910_v9 = vsub.f32 %v1903_v24, %v1909_v26 }
 0xb2f   :  { %v1911_v27 = vmul.f32 1.442695, %v1910_v9 }
 0xb31   :  { %2365 = vpow2.f32 %v1911_v27 }
 0xb3e   :  { %v2366_v28 = vpop.eup %2365 }
 0xb3f   :  { %2311 = vmatmul.mubr.msk.f32.vlgmr.msra.gmra.mxu0 %vm164_vm2, %v2366_v28  ;;  %v1913_v29 = vsel %vm164_vm2, %v2366_v28, 0.0 }
 0xb40   :  { %1914 = vadd.xlane.f32.xlu0 %v1913_v29 }
 0xb60   :  { %v1824_v30 = vpop.f32.mrf.mxu0 }
 0xb61   :  { %v1828_v31 = vadd.f32 %v1824_v30, %v1587_v4 }
 0xb62   :  { %v2302_v32 = vpop.f32.mrf.mxu0 }
 0xbc9   :  { %v1915_v34 = vpop.xlane.xlu0 %1914 }
 0xbca   :  { %2367 = vrcp.f32 %v1915_v34 }
 0xbd7   :  { %v2368_v6 = vpop.eup %2367 }
 0xbff   :  { %v1989_v35 = vpop.f32.mrf.mxu0 }
 0xc00   :  { %v1993_v36 = vmul.f32 %v2368_v6, %v1989_v35 }
 0xc01   :  { %v2312_v37 = vpop.f32.mrf.mxu0 }
 0xc02   :  { %2316 = vmatmul.mubr.msk.f32.vlgmr.msra.gmra.mxu1 %vm164_vm2, %v1993_v36 }
 0xcc2   :  { %v2063_v38 = vpop.f32.mrf.mxu1 }
 0xcc3   :  { %v2067_v39 = vadd.f32 %v2063_v38, %v1828_v31 }
 0xcc4   :  { %v2317_v40 = vpop.f32.mrf.mxu1 }
 0xcc5   :  { %v2076_v41 = vadd.f32 %v2683_v48, %v2067_v39 }
 0xcc7   :  { %2078 = vst.msk [vmem:[#allocation8 + $0x8] sm:$0xff] %vm75_vm0, %v2076_v41 }
 0xcc8   :  { %2440 = shalt.err (!%p2437_p5)
}
 0xcc9   :  { %2090 = dma.vmem_to_hbm [thread:$0]  %s2085_s21, 256, %s2736_s5, [#allocation4], %s2457_s23, %s2457_s23, %s2458_s24  }
 0xcca   :  { %2453 = dma.done.wait [#allocation4], 256  }
 0xccb   :  { %2454 = vsyncadd [#allocation4], 4294967040 }
 0xccc   :  { %2094 = vsyncpa [#allocation3], 1 }
 0xccd   :  { %2095 = vsyncpa [#allocation6], 1 }
 0xcce   :  { %2096 = vsyncpa [#allocation4], 1 }

</bundles_post_ra>
